<compile_context>
chip_gen: v7x
topology: tpu7x:2x2x1
jax: 0.10.0
libtpu: 0.0.40
codegen_flags: <defaults>
</compile_context>

<pallas_src>
import jax
import jax.numpy as jnp
from jax.experimental import pallas as pl
from jax.experimental.pallas import tpu as pltpu


# ----------------------------------------------------------------------------
# Pallas kernel: one grid step == one (batch, spatial-tile) block, NCHW layout.
# ----------------------------------------------------------------------------
def seff_kernel(x_ref, dep_ref, xgb_ref,
                lw1t_ref, lb1_ref, lw2t_ref,   # local_att (BN folded)
                o_ref):
    x = x_ref[0]            # (C, tile_HW) float32, HW on lanes
    dep = dep_ref[0]        # (C, tile_HW)
    xa = x + dep

    # local attention: 1x1 conv(+BN) -> ReLU -> 1x1 conv(+BN), per pixel.
    # weights are pre-transposed: (Cint, C) @ (C, tile_HW) -> (Cint, tile_HW)
    h = jnp.dot(lw1t_ref[...], xa, preferred_element_type=jnp.float32) + lb1_ref[...]
    h = jnp.maximum(h, 0.0)
    xl = jnp.dot(lw2t_ref[...], h, preferred_element_type=jnp.float32)

    # xgb = global-attention output + local conv2 bias, precomputed per batch
    # in the wrapper; (C, 1) broadcasts over the tile_HW lanes.
    fu = jax.nn.sigmoid(xl + xgb_ref[0])

    # 2*x*fu + 2*dep*(1-fu) == 2*(dep + (x - dep)*fu)  (fewer VPU multiplies)
    o_ref[0] = 2.0 * (dep + (x - dep) * fu)


# ----------------------------------------------------------------------------
# Wrapper
# ----------------------------------------------------------------------------
def _block_bytes(c, cint, tile_hw):
    # x, dep, out blocks double-buffered + live intermediates (h, xl/fu).
    return 3 * 2 * c * tile_hw * 4 + 2 * (c + cint) * tile_hw * 4


def _pick_tile_hw(hw, c, cint, budget_bytes=20 * 2**20):
    """Largest lane-dense tile that divides HW and fits the VMEM budget."""
    candidates = [t for t in (4096, 2048, 1024, 512, 256, 128) if hw % t == 0]
    for t in candidates:
        if _block_bytes(c, cint, t) <= budget_bytes:
            return t
    if candidates:
        return candidates[-1]      # smallest 128-multiple divisor
    return hw                      # ragged fallback: whole row of pixels


def seff_forward(x_nchw, dep_nchw, params):
    B, C, H, W = x_nchw.shape
    HW = H * W
    lw1t, lb1, lw2t, lb2, gw1t, gb1, gw2t, gb2 = params
    Cint = lw1t.shape[0]

    # Free reshapes (contiguous), no transpose passes over HBM.
    x = x_nchw.reshape(B, C, HW)
    dep = dep_nchw.reshape(B, C, HW)

    # Global-attention branch hoisted to plain JAX (O(B*C) work after the
    # fused add+mean pass); keeps spatial tiles independent inside the kernel.
    pooled = jnp.mean(x + dep, axis=2)                            # (B, C) f32
    hg = jnp.maximum(jnp.einsum('bc,ic->bi', pooled, gw1t) + gb1[:, 0], 0.0)
    xg = jnp.einsum('bi,ci->bc', hg, gw2t) + gb2[:, 0]            # (B, C)
    # Fold the local conv2 bias into the per-batch global term (exact).
    xgb = xg[:, :, None] + lb2[None]                              # (B, C, 1)

    tile_hw = _pick_tile_hw(HW, C, Cint)
    grid = (B, HW // tile_hw)

    def full_spec(shape):
        return pl.BlockSpec(shape, lambda b, t: (0,) * len(shape))

    # VMEM budget: activation blocks + intermediates + (double-buffered) weights.
    est = _block_bytes(C, Cint, tile_hw)
    est += 2 * 4 * (lw1t.size + lb1.size + lw2t.size + C)
    vmem_limit = int(min(max(2 * est, 16 * 2**20), 32 * 2**20))

    out = pl.pallas_call(
        seff_kernel,
        out_shape=jax.ShapeDtypeStruct((B, C, HW), jnp.float32),
        grid=grid,
        in_specs=[
            pl.BlockSpec((1, C, tile_hw), lambda b, t: (b, 0, t)),   # x
            pl.BlockSpec((1, C, tile_hw), lambda b, t: (b, 0, t)),   # dep
            pl.BlockSpec((1, C, 1), lambda b, t: (b, 0, 0)),         # xg + lb2
            full_spec((Cint, C)), full_spec((Cint, 1)),              # local conv1
            full_spec((C, Cint)),                                    # local conv2
        ],
        out_specs=pl.BlockSpec((1, C, tile_hw), lambda b, t: (b, 0, t)),
        compiler_params=pltpu.CompilerParams(
            dimension_semantics=("parallel", "parallel"),
            vmem_limit_bytes=vmem_limit),
    )(x, dep, xgb, lw1t, lb1, lw2t)

    return out.reshape(B, C, H, W)


# ----------------------------------------------------------------------------
# Deterministic parameter construction (synthetic weights, no checkpoint load)
# ----------------------------------------------------------------------------
def fold_conv_bn(w, b, gamma, beta, mean, var, eps=1e-5):
    """Fold inference-mode BatchNorm2d into a 1x1 conv.

    w: (Cin, Cout).  Returns (w_folded^T: (Cout, Cin), b_folded: (Cout, 1)).
    """
    scale = gamma / jnp.sqrt(var + eps)
    w_f = (w * scale[None, :]).T                       # (Cout, Cin)
    b_f = ((b - mean) * scale + beta).reshape(-1, 1)   # (Cout, 1)
    return w_f.astype(jnp.float32), b_f.astype(jnp.float32)


def make_params(key, channels, inter_channels):
    def conv_bn(key, cin, cout):
        ks = jax.random.split(key, 6)
        w = 0.1 * jax.random.normal(ks[0], (cin, cout), jnp.float32)
        b = 0.1 * jax.random.normal(ks[1], (cout,), jnp.float32)
        gamma = 1.0 + 0.1 * jax.random.normal(ks[2], (cout,), jnp.float32)
        beta = 0.1 * jax.random.normal(ks[3], (cout,), jnp.float32)
        mean = 0.1 * jax.random.normal(ks[4], (cout,), jnp.float32)
        var = 0.5 + jax.random.uniform(ks[5], (cout,), jnp.float32)
        return fold_conv_bn(w, b, gamma, beta, mean, var)

    k1, k2, k3, k4 = jax.random.split(key, 4)
    lw1t, lb1 = conv_bn(k1, channels, inter_channels)   # local_att conv1+BN
    lw2t, lb2 = conv_bn(k2, inter_channels, channels)   # local_att conv2+BN
    gw1t, gb1 = conv_bn(k3, channels, inter_channels)   # global_att conv1+BN
    gw2t, gb2 = conv_bn(k4, inter_channels, channels)   # global_att conv2+BN
    return (lw1t, lb1, lw2t, lb2, gw1t, gb1, gw2t, gb2)


# ----------------------------------------------------------------------------
# Pure-JAX reference (same math, NCHW) for verification
# ----------------------------------------------------------------------------
def seff_reference(x, dep, params):
    lw1t, lb1, lw2t, lb2, gw1t, gb1, gw2t, gb2 = params
    B, C, H, W = x.shape
    xa = (x + dep).reshape(B, C, H * W)

    h = jnp.maximum(jnp.einsum('ic,bcp->bip', lw1t, xa) + lb1[None], 0.0)
    xl = jnp.einsum('ci,bip->bcp', lw2t, h) + lb2[None]          # (B, C, HW)

    pooled = jnp.mean(xa, axis=2)                                # (B, C)
    hg = jnp.maximum(jnp.einsum('bc,ic->bi', pooled, gw1t) + gb1[:, 0], 0.0)
    xg = (jnp.einsum('bi,ci->bc', hg, gw2t) + gb2[:, 0])[:, :, None]  # (B,C,1)

    fu = jax.nn.sigmoid(xl + xg)                                 # (B, C, HW)
    xo = 2.0 * x.reshape(B, C, H * W) * fu \
         + 2.0 * dep.reshape(B, C, H * W) * (1.0 - fu)
    return xo.reshape(B, C, H, W)


if __name__ == "__main__":
    # Small shapes consistent with SEFF (channels scaled down, r=4).
    B, C, H, W = 2, 32, 16, 16
    r = 4
    Cint = C // r

    key = jax.random.PRNGKey(0)
    kx, kd, kp = jax.random.split(key, 3)
    x = jax.random.normal(kx, (B, C, H, W), jnp.float32)
    dep = jax.random.normal(kd, (B, C, H, W), jnp.float32)
    params = make_params(kp, C, Cint)

    out = seff_forward(x, dep, params)
    out = jax.block_until_ready(out)

    ref = seff_reference(x, dep, params)
    assert out.shape == (B, C, H, W)
    assert jnp.allclose(out, ref, atol=1e-4, rtol=1e-4), "mismatch vs JAX reference"

    print("KERNEL_OK")
</pallas_src>

<mosaic_0001>
module attributes {stable_mosaic.version = 11 : i64} {
  func.func @seff_kernel(%arg0: i32, %arg1: i32, %arg2: memref<1x32x256xf32, #tpu.memory_space<vmem>>, %arg3: memref<1x32x256xf32, #tpu.memory_space<vmem>>, %arg4: memref<1x32x1xf32, #tpu.memory_space<vmem>>, %arg5: memref<8x32xf32, #tpu.memory_space<vmem>>, %arg6: memref<8x1xf32, #tpu.memory_space<vmem>>, %arg7: memref<32x8xf32, #tpu.memory_space<vmem>>, %arg8: memref<1x32x256xf32, #tpu.memory_space<vmem>>) attributes {dimension_semantics = [#tpu.dimension_semantics<parallel>, #tpu.dimension_semantics<parallel>], iteration_bounds = array<i64: 2, 1>, scalar_prefetch = 0 : i64, scratch_operands = 0 : i64, tpu.core_type = #tpu.core_type<tc>, window_params = [{transform_indices = @transform_0, window_bounds = array<i64: 1, 32, 256>}, {transform_indices = @transform_1, window_bounds = array<i64: 1, 32, 256>}, {transform_indices = @transform_2, window_bounds = array<i64: 1, 32, 1>}, {pipeline_mode = #tpu.pipeline_mode<synchronous>, transform_indices = @transform_3, window_bounds = array<i64: 8, 32>}, {pipeline_mode = #tpu.pipeline_mode<synchronous>, transform_indices = @transform_4, window_bounds = array<i64: 8, 1>}, {pipeline_mode = #tpu.pipeline_mode<synchronous>, transform_indices = @transform_5, window_bounds = array<i64: 32, 8>}, {transform_indices = @transform_6, window_bounds = array<i64: 1, 32, 256>}]} {
    %c0 = arith.constant 0 : index
    %c0_0 = arith.constant 0 : index
    %c0_1 = arith.constant 0 : index
    %0 = vector.load %arg2[%c0, %c0_0, %c0_1] : memref<1x32x256xf32, #tpu.memory_space<vmem>>, vector<1x32x256xf32>
    %1 = vector.shape_cast %0 : vector<1x32x256xf32> to vector<32x256xf32>
    %c0_2 = arith.constant 0 : index
    %c0_3 = arith.constant 0 : index
    %c0_4 = arith.constant 0 : index
    %2 = vector.load %arg3[%c0_2, %c0_3, %c0_4] : memref<1x32x256xf32, #tpu.memory_space<vmem>>, vector<1x32x256xf32>
    %3 = vector.shape_cast %2 : vector<1x32x256xf32> to vector<32x256xf32>
    %4 = arith.addf %1, %3 : vector<32x256xf32>
    %c0_5 = arith.constant 0 : index
    %c0_6 = arith.constant 0 : index
    %5 = vector.load %arg5[%c0_5, %c0_6] : memref<8x32xf32, #tpu.memory_space<vmem>>, vector<8x32xf32>
    %cst = arith.constant dense<0.000000e+00> : vector<8x256xf32>
    %6 = tpu.matmul %5, %4, %cst {dimension_numbers = #tpu.dot_dimension_numbers<[1], [0], [0], [1], [0, 0, 1, 1], [], []>} : vector<8x32xf32>, vector<32x256xf32>, vector<8x256xf32> -> vector<8x256xf32>
    %c0_7 = arith.constant 0 : index
    %c0_8 = arith.constant 0 : index
    %7 = vector.load %arg6[%c0_7, %c0_8] : memref<8x1xf32, #tpu.memory_space<vmem>>, vector<8x1xf32>
    %8 = vector.broadcast %7 : vector<8x1xf32> to vector<8x256xf32>
    %9 = arith.addf %6, %8 : vector<8x256xf32>
    %cst_9 = arith.constant 0.000000e+00 : f32
    %10 = vector.broadcast %cst_9 : f32 to vector<8x256xf32>
    %11 = arith.maximumf %9, %10 : vector<8x256xf32>
    %c0_10 = arith.constant 0 : index
    %c0_11 = arith.constant 0 : index
    %12 = vector.load %arg7[%c0_10, %c0_11] : memref<32x8xf32, #tpu.memory_space<vmem>>, vector<32x8xf32>
    %cst_12 = arith.constant dense<0.000000e+00> : vector<32x256xf32>
    %13 = tpu.matmul %12, %11, %cst_12 {dimension_numbers = #tpu.dot_dimension_numbers<[1], [0], [0], [1], [0, 0, 1, 1], [], []>} : vector<32x8xf32>, vector<8x256xf32>, vector<32x256xf32> -> vector<32x256xf32>
    %c0_13 = arith.constant 0 : index
    %c0_14 = arith.constant 0 : index
    %c0_15 = arith.constant 0 : index
    %14 = vector.load %arg4[%c0_13, %c0_14, %c0_15] : memref<1x32x1xf32, #tpu.memory_space<vmem>>, vector<1x32x1xf32>
    %15 = vector.shape_cast %14 : vector<1x32x1xf32> to vector<32x1xf32>
    %16 = vector.broadcast %15 : vector<32x1xf32> to vector<32x256xf32>
    %17 = arith.addf %13, %16 : vector<32x256xf32>
    %18 = arith.negf %17 : vector<32x256xf32>
    %19 = math.exp %18 : vector<32x256xf32>
    %cst_16 = arith.constant 1.000000e+00 : f32
    %20 = vector.broadcast %cst_16 : f32 to vector<32x256xf32>
    %21 = arith.addf %20, %19 : vector<32x256xf32>
    %22 = arith.divf %20, %21 : vector<32x256xf32>
    %23 = arith.subf %1, %3 : vector<32x256xf32>
    %24 = arith.mulf %23, %22 : vector<32x256xf32>
    %25 = arith.addf %3, %24 : vector<32x256xf32>
    %cst_17 = arith.constant 2.000000e+00 : f32
    %26 = vector.broadcast %cst_17 : f32 to vector<32x256xf32>
    %27 = arith.mulf %26, %25 : vector<32x256xf32>
    %c0_18 = arith.constant 0 : index
    %c0_19 = arith.constant 0 : index
    %c0_20 = arith.constant 0 : index
    %28 = vector.load %arg8[%c0_18, %c0_19, %c0_20] : memref<1x32x256xf32, #tpu.memory_space<vmem>>, vector<1x32x256xf32>
    %29 = vector.shape_cast %28 : vector<1x32x256xf32> to vector<32x256xf32>
    %30 = vector.shape_cast %27 : vector<32x256xf32> to vector<1x32x256xf32>
    tpu.vector_store %arg8[%c0_18, %c0_19, %c0_20], %30 {strides = array<i32>} : memref<1x32x256xf32, #tpu.memory_space<vmem>>, vector<1x32x256xf32>,
    return
  }
  func.func @transform_0(%arg0: i32, %arg1: i32) -> (i32, i32, i32) {
    %c0_i32 = arith.constant 0 : i32
    %c0_i32_0 = arith.constant 0 : i32
    return %arg0, %c0_i32, %arg1 : i32, i32, i32
  }
  func.func @transform_1(%arg0: i32, %arg1: i32) -> (i32, i32, i32) {
    %c0_i32 = arith.constant 0 : i32
    %c0_i32_0 = arith.constant 0 : i32
    return %arg0, %c0_i32, %arg1 : i32, i32, i32
  }
  func.func @transform_2(%arg0: i32, %arg1: i32) -> (i32, i32, i32) {
    %c0_i32 = arith.constant 0 : i32
    %c0_i32_0 = arith.constant 0 : i32
    %c0_i32_1 = arith.constant 0 : i32
    return %arg0, %c0_i32, %c0_i32_0 : i32, i32, i32
  }
  func.func @transform_3(%arg0: i32, %arg1: i32) -> (i32, i32) {
    %c0_i32 = arith.constant 0 : i32
    %c0_i32_0 = arith.constant 0 : i32
    %c0_i32_1 = arith.constant 0 : i32
    return %c0_i32, %c0_i32_0 : i32, i32
  }
  func.func @transform_4(%arg0: i32, %arg1: i32) -> (i32, i32) {
    %c0_i32 = arith.constant 0 : i32
    %c0_i32_0 = arith.constant 0 : i32
    %c0_i32_1 = arith.constant 0 : i32
    return %c0_i32, %c0_i32_0 : i32, i32
  }
  func.func @transform_5(%arg0: i32, %arg1: i32) -> (i32, i32) {
    %c0_i32 = arith.constant 0 : i32
    %c0_i32_0 = arith.constant 0 : i32
    %c0_i32_1 = arith.constant 0 : i32
    return %c0_i32, %c0_i32_0 : i32, i32
  }
  func.func @transform_6(%arg0: i32, %arg1: i32) -> (i32, i32, i32) {
    %c0_i32 = arith.constant 0 : i32
    %c0_i32_0 = arith.constant 0 : i32
    return %arg0, %c0_i32, %arg1 : i32, i32, i32
  }
}

</mosaic_0001>

<bundles_post_ra>
// kernel: tpu_custom_call.1
= control target key start
LH: loop header
LB: loop body
LE: loop exit
PB: predicated region body
PF: predicated region fallthrough
CT: control target
= control target key end

     0   :  { %s1539_s0 = inlined_call_operand.hbm [shape: f32[2,32,256], index: 0, kind: input, shape index: {}]   ;;  %s1540_s1 = inlined_call_operand.hbm [shape: f32[2,32,256], index: 1, kind: input, shape index: {}]   ;;  %s1541_s2 = inlined_call_operand.vmem [shape: f32[2,32,1], index: 2, kind: input, shape index: {}]   ;;  %s1542_s3 = inlined_call_operand.vmem [shape: f32[8,32], index: 3, kind: input, shape index: {}]   ;;  %s1543_s4 = inlined_call_operand.vmem [shape: f32[8,1], index: 4, kind: input, shape index: {}]   ;;  %s1544_s5 = inlined_call_operand.vmem [shape: f32[32,8], index: 5, kind: input, shape index: {}]   ;;  %s1545_s6 = inlined_call_operand.hbm [shape: f32[2,32,256], index: 6, kind: output, shape index: {}]  }
   0x1   :  { %1551 = sst [smem:[#allocation12_spill]] %s1539_s0 }
   0x2   :  { %11 = vsyncpa [#allocation3], 0 }
   0x3   :  { %13 = vsyncpa [#allocation3 + $0x1], 0 }
   0x4   :  { %14 = vsyncpa [#allocation6], 0 }
   0x5   :  { %16 = vsyncpa [#allocation6 + $0x1], 0 }
   0x6   :  { %17 = vsyncpa [#allocation4], 0 }
   0x7   :  { %19 = vsyncpa [#allocation4 + $0x1], 0  ;;  %s1167_s21 = smov 0   ;;  %s1169_s22 = smov 0  }
   0x8   :  { %s1171_s23 = smov 0   ;;  %s1173_s24 = smov 0  }
   0x9   :  { %s1175_s25 = smov 0   ;;  %s1177_s26 = smov 0  }
   0xa LB: > { %s822_s27 = sadd.s32 4294967295, %s1121_s26   ;;  %s823_s28 = sadd.s32 4294967294, %s1121_s26   ;;  %s1121_s26 = sphi %s1177_s26, %s25_s26   ;;  %s1117_s25 = sphi %s1175_s25, %s1572_s25   ;;  %s1113_s24 = sphi %s1173_s24, %s1571_s24   ;;  %s1109_s23 = sphi %s1171_s23, %s1570_s23   ;;  %s1105_s22 = sphi %s1169_s22, %s1569_s22   ;;  %s1101_s21 = sphi %s1167_s21, %s1568_s21  }
   0xb   : > { %s37_s29 = sadd.s32 1, %s1117_s25  ;;  %s46_s30 = sadd.s32 1, %s1109_s23 }
   0xc   : > { %p39_p0 = scmp.ge.s32.totalorder %s37_s29, 2  ;;  %p53_p1 = scmp.ne.s32.totalorder %s1109_s23, %s1105_s22 }
   0xd   : > { %p54_p2 = scmp.eq.s32.totalorder %s1121_s26, 0  ;;  %p59_p3 = scmp.ne.s32.totalorder %s1105_s22, %s1101_s21 }
   0xe   : > { %s1574_s29 = smov (%p39_p0, %s37_s29), 0  ;;  %p60_p5 = scmp.eq.s32.totalorder %s822_s27, 0 }
   0xf   : > { %1552 = sst [smem:[#allocation11_spill]] %s1574_s29  ;;  %p1208_p4 = por %p54_p2, %p53_p1 }
  0x10   : > { %s41_s8 = ssub.s32 %s1117_s25, %s1574_s29  ;;  %p202_p6 = scmp.eq.s32.totalorder %s822_s27, 1 }
  0x11   : > { %p44_p7 = scmp.eq.s32.totalorder %s41_s8, 0  ;;  %p1214_p8 = por %p60_p5, %p59_p3 }
  0x12   : > { %p1218_p9 = por %p202_p6, %p53_p1  ;;  %p208_p10 = scmp.eq.s32.totalorder %s823_s28, 1 }
  0x13   : > { %s1554_s9 = scalar_select %p1214_p8, 1, 0 }
  0x14   : > { %s1555_s10 = scalar_select %p1218_p9, 1, 0 }
  0x15   : > { %s1223_s11 = scalar_select %p44_p7, %s1109_s23, %s46_s30  }
  0x16   : > { %p1225_p11 = por %p208_p10, %p59_p3  ;;  %p885_p13 = scmp.lt.s32.totalorder %s1121_s26, 2 }
  0x17   : > { %s1232_s13 = sand.u32 1, %s1109_s23   ;;  %s856_s15 = sshll.u32 %s1117_s25, 10 }
  0x18   : > { %s1556_s12 = scalar_select %p1225_p11, 1, 0 }
  0x19   : > { %s1546_s14 = sshll.u32 %s1232_s13, 6  ;;  %s1557_s0 = sld [smem:[#allocation12_spill]] }
  0x1a   : > { %s241_s19 = scalar_lea.vmem [#allocation2], %s1546_s14  ;;  %p1249_p0 = pnand %p885_p13, %p1208_p4 }
  0x1b   : > { %s250_s20 = sshll.u32 %s241_s19, 4  ;;  %s238_s28 = scalar_lea.sflag [#allocation3], %s1232_s13  ;;  %s1245_s20 = int_to_ptr.vmem [resolvable:$true] %s250_s20 }
  0x1c   : > { %p977_p3 = pneg %p1249_p0 }
  0x1f   : > { %s1241_s18 = scalar_lea.hbm %s1557_s0, %s856_s15  ;;  %s980_s7 = scalar_lea.hbm %s1557_s0, 2048 }
  0x20   : > { %s975_s30 = scalar_lea.hbm %s1241_s18, 1024  ;;  %p981_p4 = scmp.lt.u32.totalorder %s1241_s18, %s1557_s0 }
  0x21   : > { %p976_p2 = scmp.ne.s32.totalorder %s1241_s18, %s975_s30  ;;  %p982_p7 = scmp.lt.u32.totalorder %s980_s7, %s975_s30 }
  0x22   : > { %p984_p13 = scmp.lt.u32.totalorder %s975_s30, %s1241_s18 }
  0x23   : > { %p978_p5 = pnand %p977_p3, %p976_p2  ;;  %p983_p10 = por %p982_p7, %p981_p4 }
  0x25   : > { %p979_p6 = pneg %p978_p5  ;;  %p985_p12 = por %p984_p13, %p983_p10 }
  0x27   : > { %p986_p1 = pnand %p985_p12, %p979_p6 }
  0x29   : > { %989 = shalt.err (!%p986_p1)
}
  0x2a   : > { %s990_s14 = scalar_lea.vmem %s1245_s20, 1024  ;;  %s1123_s8 = smov [#allocation2]  }
  0x2b   : > { %p991_p2 = scmp.ne.s32.totalorder %s1245_s20, %s990_s14  ;;  %s995_s16 = sshll.u32 %s1123_s8, 4  ;;  %s996_s16 = int_to_ptr.vmem [resolvable:$false] %s995_s16 }
  0x2c   : > { %s997_s17 = scalar_lea.vmem %s996_s16, 2048  ;;  %p998_p9 = scmp.lt.s32.totalorder %s1245_s20, %s996_s16 }
  0x2d   : > { %p993_p5 = pnand %p991_p2, %p977_p3  ;;  %p999_p4 = scmp.lt.s32.totalorder %s997_s17, %s990_s14 }
  0x2f   : > { %p994_p11 = pneg %p993_p5  ;;  %p1000_p7 = por %p999_p4, %p998_p9 }
  0x31   : > { %p1001_p10 = pnand %p1000_p7, %p994_p11 }
  0x33   : > { %1004 = shalt.err (!%p1001_p10)
}
  0x34   : > { %s1549_s30 = smov 256   ;;  %s1125_s7 = smov 16  }
  0x35   : > { %877 = dma.hbm_to_vmem [thread:$0]  (!%p1249_p0), %s1241_s18, 1024, %s1245_s20, %s238_s28, %s1549_s30, %s1549_s30, %s1125_s7  }
  0x36   : > { %p289_p9 = scmp.lt.s32.totalorder %s1121_s26, 3  ;;  %s1291_s8 = scalar_lea.hbm %s1540_s1, %s856_s15 }
  0x37   : > { %p1559_p11 = scmp.ge.s32.totalorder %s1121_s26, 1  ;;  %s1561_s17 = sshll.u32 %s1232_s13, 6 }
  0x38   : > { %s264_s0 = scalar_lea.vmem [#allocation5], %s1561_s17  ;;  %s261_s18 = scalar_lea.sflag [#allocation6], %s1232_s13 }
  0x39   : > { %p1295_p12 = pnand %p1559_p11, %p289_p9  ;;  %s273_s29 = sshll.u32 %s264_s0, 4  ;;  %s1301_s29 = int_to_ptr.vmem [resolvable:$true] %s273_s29 }
  0x3a   : > { %s1005_s20 = scalar_lea.hbm %s1291_s8, 1024  ;;  %s1010_s14 = scalar_lea.hbm %s1540_s1, 2048 }
  0x3b   : > { %p1006_p1 = scmp.ne.s32.totalorder %s1291_s8, %s1005_s20  ;;  %p1011_p2 = scmp.lt.u32.totalorder %s1291_s8, %s1540_s1 }
  0x3c   : > { %p1012_p5 = scmp.lt.u32.totalorder %s1010_s14, %s1005_s20  ;;  %p1014_p7 = scmp.lt.u32.totalorder %s1005_s20, %s1291_s8 }
  0x3d   : > { %p1008_p6 = pnand %p1006_p1, %p977_p3 }
  0x3e   : > { %p1013_p4 = por %p1012_p5, %p1011_p2 }
  0x3f   : > { %p1009_p13 = pneg %p1008_p6 }
  0x40   : > { %p1015_p10 = por %p1014_p7, %p1013_p4 }
  0x42   : > { %p1016_p9 = pnand %p1015_p10, %p1009_p13 }
  0x44   : > { %1019 = shalt.err (!%p1016_p9)
}
  0x45   : > { %s1020_s0 = scalar_lea.vmem %s1301_s29, 1024  ;;  %s1126_s17 = smov [#allocation5]  }
  0x46   : > { %p1021_p11 = scmp.ne.s32.totalorder %s1301_s29, %s1020_s0  ;;  %s1025_s15 = sshll.u32 %s1126_s17, 4  ;;  %s1026_s15 = int_to_ptr.vmem [resolvable:$false] %s1025_s15 }
  0x47   : > { %s1027_s30 = scalar_lea.vmem %s1026_s15, 2048  ;;  %p1028_p8 = scmp.lt.s32.totalorder %s1301_s29, %s1026_s15 }
  0x48   : > { %p1023_p1 = pnand %p1021_p11, %p977_p3  ;;  %p1029_p2 = scmp.lt.s32.totalorder %s1027_s30, %s1020_s0 }
  0x4a   : > { %p1024_p6 = pneg %p1023_p1  ;;  %p1030_p5 = por %p1029_p2, %p1028_p8 }
  0x4c   : > { %p1031_p4 = pnand %p1030_p5, %p1024_p6 }
  0x4e   : > { %1034 = shalt.err (!%p1031_p4)
}
  0x4f   : > { %s1562_s20 = smov 256   ;;  %293 = sbr.rel (%p1295_p12) target bundleno = 599 (0x257), region = 44 }
  0x50   : > { %880 = dma.hbm_to_vmem [thread:$0]  (!%p1249_p0), %s1291_s8, 1024, %s1301_s29, %s261_s18, %s1562_s20, %s1562_s20, %s1125_s7  }
  0x51   : > { %s1335_s28 = sand.u32 (!%p1295_p12), 1, %s1105_s22   ;;  %p1563_p8 = scmp.ne.s32.totalorder (!%p1295_p12), %s1554_s9, 0 }
  0x52   : > { %s1338_s14 = sshll.u32 (!%p1295_p12), %s1335_s28, 6  ;;  %s296_s27 = scalar_lea.sflag (!%p1295_p12), [#allocation3], %s1335_s28 }
  0x53   : > { %s1342_s19 = scalar_lea.vmem (!%p1295_p12), [#allocation2], %s1338_s14 }
  0x56   : > { %1088 = dma.done.wait (%p1563_p8), %s296_s27, 1024  }
  0x57   : > { %1090 = vsyncadd (%p1563_p8), %s296_s27, 4294966272  ;;  %s305_s29 = scalar_lea.sflag [#allocation6], %s1335_s28  ;;  %s1350_s13 = scalar_lea.vmem [#allocation5], %s1338_s14 }
  0x58   : > { %1092 = dma.done.wait (%p1563_p8), %s305_s29, 1024  }
  0x59   : > { %1094 = vsyncadd (%p1563_p8), %s305_s29, 4294966272  ;;  %p349_p0 = scmp.lt.s32.totalorder %s1113_s24, 1  ;;  %v1127_v0 = vmov 0.0   ;;  %v1128_v1 = vmov 0   ;;  %v1361_v2 = vld [vmem:[%s1342_s19 + $0x8] sm:$0xff]  ;;  %v1364_v3 = vld [vmem:[%s1342_s19 + $0x18] sm:$0xff] }
  0x5a   : > { %454 = vmatprep.mubr.f32.mxu0 %v1127_v0  ;;  %941 = vset.pattern.permute.xlu0 %v1128_v1  ;;  %v1367_v4 = vld [vmem:[%s1350_s13 + $0x8] sm:$0xff]  ;;  %v1370_v5 = vld [vmem:[%s1350_s13 + $0x18] sm:$0xff]  ;;  %v1375_v7 = vld [vmem:[%s1342_s19] sm:$0xff]  ;;  %vm386_vm0 = vcmask 261120   ;;  %vm491_vm1 = vcmask 64512   ;;  %s1463_s16 = scalar_lea.vmem [#allocation7], %s1338_s14 }
  0x5b   : > { %568 = vmatprep.mubr.f32.mxu1 %v1127_v0  ;;  %942 = vset.pattern.permute.xlu1 %v1128_v1  ;;  %s350_s9 = scalar_select %p349_p0, %s1113_s24, 1  ;;  %v372_v6 = vadd.f32 %v1367_v4, %v1361_v2  ;;  %v1378_v8 = vld [vmem:[%s1342_s19 + $0x10] sm:$0xff]  ;;  %v374_v9 = vadd.f32 %v1370_v5, %v1364_v3  ;;  %v1383_v10 = vld [vmem:[%s1350_s13] sm:$0xff]  ;;  %v1389_v12 = vld [vmem:[%s1342_s19 + $0x28] sm:$0xff] }
  0x5c   : > { %v1386_v11 = vld [vmem:[%s1350_s13 + $0x10] sm:$0xff]  ;;  %v371_v13 = vadd.f32 %v1383_v10, %v1375_v7  ;;  %v1396_v15 = vld [vmem:[%s1342_s19 + $0x38] sm:$0xff]  ;;  %v1399_v16 = vld [vmem:[%s1350_s13 + $0x28] sm:$0xff]  ;;  %s859_s14 = sshll.u32 %s1113_s24, 10  ;;  %s682_s30 = scalar_lea.sflag [#allocation4], %s1335_s28 }
  0x5d   : > { %s858_s7 = sshll.u32 %s350_s9, 5  ;;  %v373_v14 = vadd.f32 %v1386_v11, %v1378_v8  ;;  %v1402_v17 = vld [vmem:[%s1350_s13 + $0x38] sm:$0xff]  ;;  %v860_v18 = vpack.c.bf16 %v374_v9, %v372_v6  ;;  %v376_v19 = vadd.f32 %v1399_v16, %v1389_v12  ;;  %v1409_v21 = vld [vmem:[%s1342_s19 + $0x20] sm:$0xff]  ;;  %v1412_v22 = vld [vmem:[%s1342_s19 + $0x30] sm:$0xff]  ;;  %s1487_s15 = scalar_lea.hbm %s1545_s6, %s859_s14 }
  0x5e   : > { %v378_v20 = vadd.f32 %v1402_v17, %v1396_v15  ;;  %v1415_v23 = vld [vmem:[%s1350_s13 + $0x20] sm:$0xff]  ;;  %s353_s18 = scalar_lea.vmem %s1541_s2, %s858_s7  ;;  %v1421_v25 = vld [vmem:[%s1350_s13 + $0x30] sm:$0xff]  ;;  %v464_v44 = vld [vmem:[%s1544_s5 + $0x8] sm:$0xff]  ;;  %p1564_p12 = scmp.ne.s32.totalorder %s1555_s10, 0 }
  0x5f   : > { %v862_v24 = vpack.c.bf16 %v373_v14, %v371_v13  ;;  %v375_v26 = vadd.f32 %v1415_v23, %v1409_v21  ;;  %v380_v27 = vld [vmem:[%s1543_s4] sm:$0xff]  ;;  %861 = vmatprep.subr.bf16.mxu0 %v860_v18  ;;  %v377_v29 = vadd.f32 %v1421_v25, %v1412_v22  ;;  %v470_v33 = vld [vmem:[%s353_s18 + $0x18] sm:$0xff]  ;;  %v468_v34 = vld [vmem:[%s353_s18 + $0x8] sm:$0xff]  ;;  %s1129_s24 = smov [#allocation7]  }
  0x60   : > { %v864_v28 = vpack.c.bf16 %v378_v20, %v376_v19  ;;  %383 = vperm.xlu0 %941, %v380_v27   ;;  %v467_v30 = vld [vmem:[%s353_s18] sm:$0xff]  ;;  %478 = vperm.xlu1 %942, %v468_v34   ;;  %v469_v35 = vld [vmem:[%s353_s18 + $0x10] sm:$0xff]  ;;  %v466_v46 = vld [vmem:[%s1544_s5 + $0x18] sm:$0xff]  ;;  %s697_s18 = sshll.u32 %s1463_s16, 4  ;;  %s1039_s27 = sshll.u32 %s1129_s24, 4  ;;  %s1489_s18 = int_to_ptr.vmem [resolvable:$true] %s697_s18  ;;  %s1040_s27 = int_to_ptr.vmem [resolvable:$false] %s1039_s27 }
  0x61   : > { %863 = vmatpush1.bf16.msra.mxu0 %v862_v24  ;;  %v866_v31 = vpack.c.bf16 %v377_v29, %v375_v26  ;;  %v379_v32 = vld [vmem:[%s1542_s3] sm:$0xff]  ;;  %v465_v45 = vld [vmem:[%s1544_s5 + $0x10] sm:$0xff]  ;;  %s1035_s20 = scalar_lea.vmem %s1489_s18, 1024  ;;  %s1041_s19 = scalar_lea.vmem %s1040_s27, 2048 }
  0x62   : > { %865 = vmatprep.subr.bf16.mxu0 %v864_v28  ;;  %v463_v43 = vld [vmem:[%s1544_s5] sm:$0xff]  ;;  %p1036_p3 = scmp.ne.s32.totalorder %s1489_s18, %s1035_s20  ;;  %p1042_p10 = scmp.lt.s32.totalorder %s1489_s18, %s1040_s27 }
  0x63   : > { %p1043_p9 = scmp.lt.s32.totalorder %s1041_s19, %s1035_s20 }
  0x64   : > { %473 = vperm.xlu0 %941, %v467_v30   ;;  %483 = vperm.xlu1 %942, %v469_v35   ;;  %p1037_p13 = pnand %p1036_p3, %p1564_p12 }
  0x65   : > { %867 = vmatpush1.bf16.msra.mxu0 %v866_v31  ;;  %p1044_p11 = por %p1043_p9, %p1042_p10 }
  0x66   : > { %p1038_p7 = pneg %p1037_p13 }
  0x68   : > { %838 = vmatmul.mubr.msk.f32.vlgmr.msra.gmra.mrb[0].mxu0 %vm386_vm0, %v379_v32  ;;  %488 = vperm.xlu0 %941, %v470_v33   ;;  %p1045_p1 = pnand %p1044_p11, %p1038_p7 }
  0xdf   : > { %v384_v36 = vpop.permute.xlu0 %383  ;;  %v479_v49 = vpop.permute.xlu1 %478 }
  0xe3   : > { %v474_v47 = vpop.permute.xlu0 %473  ;;  %v484_v59 = vpop.permute.xlu1 %483 }
  0xe7   : > { %v489_v9 = vpop.permute.xlu0 %488 }
 0x13b   : > { %v456_v37 = vpop.f32.mrb[0].mxu0 }
 0x13c   : > { %v457_v38 = vadd.f32 %v456_v37, %v384_v36  ;;  %v458_v39 = vpop.f32.mrb[1].mxu0 }
 0x13d   : > { %v459_v40 = vadd.f32 %v458_v39, %v384_v36 }
 0x13e   : > { %v461_v42 = vmax.f32 %v457_v38, 0.0  ;;  %v641_v38 = vsub.f32 %v1375_v7, %v1383_v10 }
 0x13f   : > { %v462_v41 = vmax.f32 %v459_v40, 0.0  ;;  %v642_v40 = vsub.f32 %v1361_v2, %v1367_v4 }
 0x141   : > { %504 = vmatprep.subr.mxu1 %v462_v41 }
 0x142   : > { %505 = vmatpush1.msra.mxu1 %v461_v42 }
 0x143   : > { %839 = vmatmul.mubr.msk.f32.vlgmr.msra.gmra.mrb[0].mxu1 %vm491_vm1, %v463_v43 }
 0x144   : > { %574 = vmatprep.mubr.f32.mxu1 %v1127_v0 }
 0x147   : > { %840 = vmatmul.mubr.msk.f32.gmra.mrb[2].mxu1 %vm491_vm1, %v464_v44 }
 0x148   : > { %580 = vmatprep.mubr.f32.mxu1 %v1127_v0 }
 0x14b   : > { %841 = vmatmul.mubr.msk.f32.gmra.mrb[4].mxu1 %vm491_vm1, %v465_v45  ;;  %v643_v45 = vsub.f32 %v1378_v8, %v1386_v11 }
 0x14c   : > { %586 = vmatprep.mubr.f32.mxu1 %v1127_v0 }
 0x14f   : > { %842 = vmatmul.mubr.msk.f32.gmra.mrb[6].mxu1 %vm491_vm1, %v466_v46 }
 0x216   : > { %v570_v48 = vpop.f32.mrb[0].mxu1 }
 0x217   : > { %v571_v50 = vadd.f32 %v570_v48, %v474_v47  ;;  %v572_v51 = vpop.f32.mrb[1].mxu1  ;;  %v644_v48 = vsub.f32 %v1364_v3, %v1370_v5 }
 0x218   : > { %v573_v52 = vadd.f32 %v572_v51, %v474_v47 }
 0x219   : > { %v843_v53 = vmul.f32 -1.442695, %v571_v50 }
 0x21a   : > { %v844_v54 = vmul.f32 -1.442695, %v573_v52  ;;  %v576_v55 = vpop.f32.mrb[2].mxu1 }
 0x21b   : > { %943 = vpow2.f32 %v843_v53  ;;  %v577_v56 = vadd.f32 %v576_v55, %v479_v49  ;;  %v578_v57 = vpop.f32.mrb[3].mxu1  ;;  %v645_v53 = vsub.f32 %v1409_v21, %v1415_v23  ;;  %v646_v55 = vsub.f32 %v1389_v12, %v1399_v16 }
 0x21c   : > { %945 = vpow2.f32 %v844_v54  ;;  %v579_v58 = vadd.f32 %v578_v57, %v479_v49  ;;  %v647_v12 = vsub.f32 %v1412_v22, %v1421_v25 }
 0x21d   : > { %v845_v60 = vmul.f32 -1.442695, %v577_v56 }
 0x21e   : > { %v846_v61 = vmul.f32 -1.442695, %v579_v58  ;;  %v582_v62 = vpop.f32.mrb[4].mxu1 }
 0x21f   : > { %947 = vpow2.f32 %v845_v60  ;;  %v583_v63 = vadd.f32 %v582_v62, %v484_v59  ;;  %v584_v0 = vpop.f32.mrb[5].mxu1 }
 0x220   : > { %949 = vpow2.f32 %v846_v61  ;;  %v585_v1 = vadd.f32 %v584_v0, %v484_v59 }
 0x221   : > { %v847_v6 = vmul.f32 -1.442695, %v583_v63 }
 0x222   : > { %v848_v13 = vmul.f32 -1.442695, %v585_v1  ;;  %v588_v14 = vpop.f32.mrb[6].mxu1 }
 0x223   : > { %951 = vpow2.f32 %v847_v6  ;;  %v589_v18 = vadd.f32 %v588_v14, %v489_v9  ;;  %v590_v19 = vpop.f32.mrb[7].mxu1 }
 0x224   : > { %953 = vpow2.f32 %v848_v13  ;;  %v591_v20 = vadd.f32 %v590_v19, %v489_v9 }
 0x225   : > { %v944_v24 = vpop.eup %943  ;;  %v849_v26 = vmul.f32 -1.442695, %v589_v18 }
 0x226   : > { %v946_v27 = vpop.eup %945  ;;  %v617_v28 = vadd.f32 1.0, %v944_v24  ;;  %v850_v29 = vmul.f32 -1.442695, %v591_v20 }
 0x227   : > { %v618_v30 = vadd.f32 1.0, %v946_v27  ;;  %955 = vpow2.f32 %v849_v26 }
 0x228   : > { %957 = vrcp.f32 %v617_v28 }
 0x229   : > { %v948_v31 = vpop.eup %947  ;;  %959 = vrcp.f32 %v618_v30 }
 0x22a   : > { %v950_v32 = vpop.eup %949  ;;  %v619_v33 = vadd.f32 1.0, %v948_v31  ;;  %961 = vpow2.f32 %v850_v29 }
 0x22b   : > { %v620_v34 = vadd.f32 1.0, %v950_v32 }
 0x22c   : > { %963 = vrcp.f32 %v619_v33 }
 0x22d   : > { %v952_v35 = vpop.eup %951  ;;  %965 = vrcp.f32 %v620_v34 }
 0x22e   : > { %v954_v36 = vpop.eup %953  ;;  %v621_v37 = vadd.f32 1.0, %v952_v35 }
 0x22f   : > { %v622_v39 = vadd.f32 1.0, %v954_v36 }
 0x230   : > { %967 = vrcp.f32 %v621_v37 }
 0x231   : > { %v956_v41 = vpop.eup %955  ;;  %969 = vrcp.f32 %v622_v39 }
 0x232   : > { %v958_v42 = vpop.eup %957  ;;  %v623_v43 = vadd.f32 1.0, %v956_v41 }
 0x233   : > { %v960_v44 = vpop.eup %959  ;;  %v649_v46 = vmul.f32 %v958_v42, %v641_v38 }
 0x234   : > { %v962_v47 = vpop.eup %961  ;;  %v650_v7 = vmul.f32 %v960_v44, %v642_v40  ;;  %971 = vrcp.f32 %v623_v43 }
 0x235   : > { %v657_v49 = vadd.f32 %v649_v46, %v1383_v10  ;;  %v624_v2 = vadd.f32 1.0, %v962_v47 }
 0x236   : > { %v964_v50 = vpop.eup %963  ;;  %v658_v51 = vadd.f32 %v650_v7, %v1367_v4 }
 0x237   : > { %v966_v52 = vpop.eup %965  ;;  %v665_v54 = vmul.f32 2.0, %v657_v49  ;;  %v651_v8 = vmul.f32 %v964_v50, %v643_v45  ;;  %973 = vrcp.f32 %v624_v2 }
 0x238   : > { %v666_v56 = vmul.f32 2.0, %v658_v51  ;;  %v652_v3 = vmul.f32 %v966_v52, %v644_v48 }
 0x239   : > { %673 = vst [vmem:[%s1463_s16] sm:$0xff] %v665_v54  ;;  %v659_v4 = vadd.f32 %v651_v8, %v1386_v11 }
 0x23a   : > { %v968_v10 = vpop.eup %967  ;;  %674 = vst [vmem:[%s1463_s16 + $0x8] sm:$0xff] %v666_v56  ;;  %v660_v21 = vadd.f32 %v652_v3, %v1370_v5  ;;  %v648_v5 = vsub.f32 %v1396_v15, %v1402_v17 }
 0x23b   : > { %v970_v57 = vpop.eup %969  ;;  %v667_v58 = vmul.f32 2.0, %v659_v4  ;;  %v653_v59 = vmul.f32 %v968_v10, %v645_v53 }
 0x23c   : > { %v668_v60 = vmul.f32 2.0, %v660_v21  ;;  %v654_v61 = vmul.f32 %v970_v57, %v646_v55 }
 0x23d   : > { %675 = vst [vmem:[%s1463_s16 + $0x10] sm:$0xff] %v667_v58  ;;  %v661_v62 = vadd.f32 %v653_v59, %v1415_v23 }
 0x23e   : > { %v972_v11 = vpop.eup %971  ;;  %676 = vst [vmem:[%s1463_s16 + $0x18] sm:$0xff] %v668_v60  ;;  %v662_v63 = vadd.f32 %v654_v61, %v1399_v16 }
 0x23f   : > { %v669_v0 = vmul.f32 2.0, %v661_v62  ;;  %v655_v22 = vmul.f32 %v972_v11, %v647_v12 }
 0x240   : > { %v670_v1 = vmul.f32 2.0, %v662_v63 }
 0x241   : > { %v974_v6 = vpop.eup %973  ;;  %677 = vst [vmem:[%s1463_s16 + $0x20] sm:$0xff] %v669_v0  ;;  %v663_v9 = vadd.f32 %v655_v22, %v1421_v25 }
 0x242   : > { %678 = vst [vmem:[%s1463_s16 + $0x28] sm:$0xff] %v670_v1  ;;  %v656_v23 = vmul.f32 %v974_v6, %v648_v5 }
 0x243   : > { %v671_v13 = vmul.f32 2.0, %v663_v9 }
 0x244   : > { %v664_v15 = vadd.f32 %v656_v23, %v1402_v17 }
 0x245   : > { %679 = vst [vmem:[%s1463_s16 + $0x30] sm:$0xff] %v671_v13 }
 0x246   : > { %v672_v16 = vmul.f32 2.0, %v664_v15 }
 0x248   : > { %680 = vst [vmem:[%s1463_s16 + $0x38] sm:$0xff] %v672_v16 }
 0x249   : > { %1048 = shalt.err (!%p1045_p1)
}
 0x24a   : > { %s1049_s29 = scalar_lea.hbm %s1487_s15, 1024  ;;  %s1053_s7 = scalar_lea.hbm %s1545_s6, 2048 }
 0x24b   : > { %p1050_p6 = scmp.ne.s32.totalorder %s1487_s15, %s1049_s29  ;;  %p1054_p4 = scmp.lt.u32.totalorder %s1487_s15, %s1545_s6 }
 0x24c   : > { %p1055_p8 = scmp.lt.u32.totalorder %s1053_s7, %s1049_s29  ;;  %p1057_p3 = scmp.lt.u32.totalorder %s1049_s29, %s1487_s15 }
 0x24d   : > { %p1051_p2 = pnand %p1050_p6, %p1564_p12 }
 0x24e   : > { %p1056_p0 = por %p1055_p8, %p1054_p4 }
 0x24f   : > { %p1052_p5 = pneg %p1051_p2 }
 0x250   : > { %p1058_p13 = por %p1057_p3, %p1056_p0 }
 0x252   : > { %p1059_p7 = pnand %p1058_p13, %p1052_p5 }
 0x254   : > { %1062 = shalt.err (!%p1059_p7)
}
 0x255   : > { %s1130_s14 = smov 256   ;;  %s1131_s0 = smov 16  }
 0x256   : > { %872 = dma.vmem_to_hbm [thread:$0]  (%p1564_p12), %s1489_s18, 1024, %s1487_s15, %s682_s30, %s1130_s14, %s1130_s14, %s1131_s0  }
 0x257 PF: > { %s712_s17 = sand.u32 1, %s1101_s21   ;;  %p1565_p10 = scmp.ne.s32.totalorder %s1556_s12, 0 }
 0x258   : > { %p1566_p9 = scmp.ge.s32.totalorder %s1121_s26, 2  ;;  %s713_s20 = scalar_lea.sflag [#allocation4], %s712_s17 }
 0x25a   : > { %p882_p11 = pnand %p1566_p9, %p1565_p10 }
 0x25c   : > { %1096 = dma.done.wait (!%p882_p11), %s713_s20, 1024  }
 0x25d   : > { %1098 = vsyncadd (!%p882_p11), %s713_s20, 4294966272  ;;  %s25_s26 = sadd.s32 1, %s1121_s26   ;;  %s1567_s10 = sld [smem:[#allocation11_spill]] }
 0x25e   : > { %p22_p1 = scmp.ge.s32.totalorder %s25_s26, 4   ;;  %s1568_s21 = smov %s1105_s22 }
 0x25f   : > { %s1569_s22 = smov %s1109_s23  ;;  %s1570_s23 = smov %s1223_s11 }
 0x260   : > { %s1571_s24 = smov %s1117_s25  ;;  %24 = sbr.rel (!%p22_p1) target bundleno = 10 (0xa), region = 105 }
 0x263   : > { %s1572_s25 = smov %s1567_s10 }
 0x267   :  { %718 = vsyncpa [#allocation3], 1 }
 0x268   :  { %720 = vsyncpa [#allocation3 + $0x1], 1 }
 0x269   :  { %721 = vsyncpa [#allocation6], 1 }
 0x26a   :  { %723 = vsyncpa [#allocation6 + $0x1], 1 }
 0x26b   :  { %724 = vsyncpa [#allocation4], 1 }
 0x26c   :  { %726 = vsyncpa [#allocation4 + $0x1], 1 }

</bundles_post_ra>
